<compile_context>
chip_gen: v5e
topology: v5e:2x2
jax: 0.10.0
libtpu: 0.0.40
codegen_flags: <defaults>
</compile_context>

<pallas_src>
import math

import jax
import jax.numpy as jnp
from jax.experimental import pallas as pl
from jax.experimental.pallas import tpu as pltpu

# ----- synthetic "demo" model config (small, TPU-friendly) -----
VOCAB = 128
SEQ = 8
HIDDEN = 32
FFN = 64
NUM_LABELS = 2
LANE = 128          # lane-dense padded logits width


def _layernorm(x, g, b, eps=1e-12):
    # single-pass variance: E[x^2] - mu^2 (halves the XLU reductions)
    mu = jnp.mean(x, axis=-1, keepdims=True)
    var = jnp.maximum(jnp.mean(x * x, axis=-1, keepdims=True) - mu * mu, 0.0)
    return (x - mu) * jax.lax.rsqrt(var + eps) * g + b


def _gelu(x):
    # TODO(synk): HF BERT defaults to exact erf GELU; tanh approximation used here.
    c = math.sqrt(2.0 / math.pi)
    return 0.5 * x * (1.0 + jnp.tanh(c * (x + 0.044715 * x * x * x)))


def _mm(a, b):
    # (M,K) @ (K,N) on the MXU with f32 accumulation; operands are bf16.
    return jax.lax.dot_general(a, b, (((1,), (0,)), ((), ())),
                               preferred_element_type=jnp.float32)


def encoder_cls_kernel(x_ref, wqkv_ref, bqkv_ref, wo_ref, vecs_ref,
                       w1_ref, b1_ref, w2_ref, wp_ref, wc_ref, bc_ref,
                       out_ref):
    """Processes BB sequences per grid step: full encoder + classifier."""
    BB, S, H = x_ref.shape
    M = BB * S

    x = x_ref[...].astype(jnp.float32)              # (BB, S, H)
    vecs = vecs_ref[...]                            # (9, H) f32 stacked LN/bias rows

    def row(i):
        return vecs[i:i + 1, :]                     # (1, H)

    # ---- embedding LayerNorm on the flattened token matrix ----
    h = _layernorm(x.reshape(M, H), row(0), row(1))     # (M, H) f32

    # ---- fused QKV projection (scale folded into Q at pack time) ----
    qkv = _mm(h.astype(jnp.bfloat16), wqkv_ref[...]) + bqkv_ref[...]   # (M, 3H) f32
    q = qkv[:, :H].reshape(BB, S, H)
    k = qkv[:, H:2 * H].reshape(BB, S, H)
    v = qkv[:, 2 * H:].reshape(BB, S, H)

    # ---- per-sequence self-attention (no cross-sequence mixing) ----
    scores = jnp.einsum('bqd,bkd->bqk',
                        q.astype(jnp.bfloat16), k.astype(jnp.bfloat16),
                        preferred_element_type=jnp.float32)            # (BB, S, S)
    scores = scores - jnp.max(scores, axis=-1, keepdims=True)
    p = jnp.exp(scores)
    p = p * pl.reciprocal(jnp.sum(p, axis=-1, keepdims=True), approx=True)
    ctx = jnp.einsum('bqk,bkd->bqd',
                     p.astype(jnp.bfloat16), v.astype(jnp.bfloat16),
                     preferred_element_type=jnp.float32).reshape(M, H)

    attn = _mm(ctx.astype(jnp.bfloat16), wo_ref[...]) + row(6)
    h1 = _layernorm(h + attn, row(2), row(3))

    # ---- feed-forward ----
    f = _gelu(_mm(h1.astype(jnp.bfloat16), w1_ref[...]) + b1_ref[...])
    f = _mm(f.astype(jnp.bfloat16), w2_ref[...]) + row(7)
    h2 = _layernorm(h1 + f, row(4), row(5))

    # ---- pooler on [CLS] tokens + classification head (all BB at once) ----
    cls = h2.reshape(BB, S, H)[:, 0, :]                               # (BB, H)
    pooled = jnp.tanh(_mm(cls.astype(jnp.bfloat16), wp_ref[...]) + row(8))
    logits = _mm(pooled.astype(jnp.bfloat16), wc_ref[...]) + bc_ref[...]   # (BB, LANE)
    out_ref[...] = logits                                             # lane-dense store


def _pack_params(params):
    """Fuse QKV, fold the attention scale, stack small vectors, bf16 weights."""
    H = HIDDEN
    scale = 1.0 / math.sqrt(H)
    wqkv = jnp.concatenate(
        [params["wq"] * scale, params["wk"], params["wv"]], axis=1)        # (H, 3H)
    bqkv = jnp.concatenate(
        [params["bq"] * scale, params["bk"], params["bv"]], axis=1)        # (1, 3H)
    vecs = jnp.concatenate(
        [params["ln0_g"], params["ln0_b"],
         params["ln1_g"], params["ln1_b"],
         params["ln2_g"], params["ln2_b"],
         params["bo"], params["b2"], params["bp"]], axis=0)                # (9, H)
    wc_pad = jnp.zeros((H, LANE), jnp.float32).at[:, :NUM_LABELS].set(params["wc"])
    bc_pad = jnp.zeros((1, LANE), jnp.float32).at[:, :NUM_LABELS].set(params["bc"])
    return dict(
        wqkv=wqkv.astype(jnp.bfloat16),
        bqkv=bqkv.astype(jnp.float32),
        wo=params["wo"].astype(jnp.bfloat16),
        vecs=vecs.astype(jnp.float32),
        w1=params["w1"].astype(jnp.bfloat16),
        b1=params["b1"].astype(jnp.float32),
        w2=params["w2"].astype(jnp.bfloat16),
        wp=params["wp"].astype(jnp.bfloat16),
        wc=wc_pad.astype(jnp.bfloat16),
        bc=bc_pad.astype(jnp.float32),
    )


_PACKED_NAMES = ["wqkv", "bqkv", "wo", "vecs", "w1", "b1", "w2", "wp", "wc", "bc"]


def pytoscript_forward(token_ids, params, block_batch=None):
    """Equivalent of PyToScript.forward(data) -> logits of shape [B, 2]."""
    B, S = token_ids.shape
    assert S == SEQ

    packed = _pack_params(params)
    weights = [packed[n] for n in _PACKED_NAMES]

    # Embedding lookup (gather) is glue; everything else runs in the kernel.
    x = params["word_emb"][token_ids] + params["pos_emb"][None, :, :]   # (B,S,H)
    x = x.astype(jnp.bfloat16)                                          # halve DMA

    # Batch-pack many sequences per grid step.
    BB = min(B, 64) if block_batch is None else block_batch
    nb = (B + BB - 1) // BB
    Bp = nb * BB
    if Bp != B:
        x = jnp.pad(x, ((0, Bp - B), (0, 0), (0, 0)))

    def full_spec(a):
        nd = a.ndim
        return pl.BlockSpec(a.shape, lambda b, _nd=nd: (0,) * _nd)

    in_specs = [pl.BlockSpec((BB, SEQ, HIDDEN), lambda b: (b, 0, 0))]
    in_specs += [full_spec(w) for w in weights]

    out = pl.pallas_call(
        encoder_cls_kernel,
        out_shape=jax.ShapeDtypeStruct((Bp, LANE), jnp.float32),
        grid_spec=pltpu.PrefetchScalarGridSpec(
            num_scalar_prefetch=0,
            grid=(nb,),
            in_specs=in_specs,
            out_specs=pl.BlockSpec((BB, LANE), lambda b: (b, 0)),
        ),
        compiler_params=pltpu.CompilerParams(
            dimension_semantics=("parallel",)),
    )(x, *weights)
    return out[:B, :NUM_LABELS]


def init_params(key):
    ks = jax.random.split(key, 10)

    def n(k, shape, scale=0.02):
        return (scale * jax.random.normal(k, shape)).astype(jnp.float32)

    H, F = HIDDEN, FFN
    z = lambda shape: jnp.zeros(shape, jnp.float32)
    o = lambda shape: jnp.ones(shape, jnp.float32)
    return dict(
        word_emb=n(ks[0], (VOCAB, H)),
        pos_emb=n(ks[1], (SEQ, H)),
        ln0_g=o((1, H)), ln0_b=z((1, H)),
        wq=n(ks[2], (H, H)), bq=z((1, H)),
        wk=n(ks[3], (H, H)), bk=z((1, H)),
        wv=n(ks[4], (H, H)), bv=z((1, H)),
        wo=n(ks[5], (H, H)), bo=z((1, H)),
        ln1_g=o((1, H)), ln1_b=z((1, H)),
        w1=n(ks[6], (H, F)), b1=z((1, F)),
        w2=n(ks[7], (F, H)), b2=z((1, H)),
        ln2_g=o((1, H)), ln2_b=z((1, H)),
        wp=n(ks[8], (H, H)), bp=z((1, H)),
        wc=n(ks[9], (H, NUM_LABELS)), bc=z((1, NUM_LABELS)),
    )


if __name__ == "__main__":
    key = jax.random.PRNGKey(0)
    pkey, dkey = jax.random.split(key)
    params = init_params(pkey)
    token_ids = jax.random.randint(dkey, (2, SEQ), 0, VOCAB, dtype=jnp.int32)

    logits = pytoscript_forward(token_ids, params)
    jax.block_until_ready(logits)
    assert logits.shape == (2, NUM_LABELS)
    assert logits.dtype == jnp.float32
    print("KERNEL_OK")
</pallas_src>

<mosaic_0001>
module attributes {stable_mosaic.version = 11 : i64} {
  func.func @encoder_cls_kernel(%arg0: i32, %arg1: memref<2x8x32xbf16, #tpu.memory_space<vmem>>, %arg2: memref<32x96xbf16, #tpu.memory_space<vmem>>, %arg3: memref<1x96xf32, #tpu.memory_space<vmem>>, %arg4: memref<32x32xbf16, #tpu.memory_space<vmem>>, %arg5: memref<9x32xf32, #tpu.memory_space<vmem>>, %arg6: memref<32x64xbf16, #tpu.memory_space<vmem>>, %arg7: memref<1x64xf32, #tpu.memory_space<vmem>>, %arg8: memref<64x32xbf16, #tpu.memory_space<vmem>>, %arg9: memref<32x32xbf16, #tpu.memory_space<vmem>>, %arg10: memref<32x128xbf16, #tpu.memory_space<vmem>>, %arg11: memref<1x128xf32, #tpu.memory_space<vmem>>, %arg12: memref<2x128xf32, #tpu.memory_space<vmem>>) attributes {dimension_semantics = [#tpu.dimension_semantics<parallel>], iteration_bounds = array<i64: 1>, scalar_prefetch = 0 : i64, scratch_operands = 0 : i64, tpu.core_type = #tpu.core_type<tc>, window_params = [{transform_indices = @transform_0, window_bounds = array<i64: 2, 8, 32>}, {pipeline_mode = #tpu.pipeline_mode<synchronous>, transform_indices = @transform_1, window_bounds = array<i64: 32, 96>}, {pipeline_mode = #tpu.pipeline_mode<synchronous>, transform_indices = @transform_2, window_bounds = array<i64: 1, 96>}, {pipeline_mode = #tpu.pipeline_mode<synchronous>, transform_indices = @transform_3, window_bounds = array<i64: 32, 32>}, {pipeline_mode = #tpu.pipeline_mode<synchronous>, transform_indices = @transform_4, window_bounds = array<i64: 9, 32>}, {pipeline_mode = #tpu.pipeline_mode<synchronous>, transform_indices = @transform_5, window_bounds = array<i64: 32, 64>}, {pipeline_mode = #tpu.pipeline_mode<synchronous>, transform_indices = @transform_6, window_bounds = array<i64: 1, 64>}, {pipeline_mode = #tpu.pipeline_mode<synchronous>, transform_indices = @transform_7, window_bounds = array<i64: 64, 32>}, {pipeline_mode = #tpu.pipeline_mode<synchronous>, transform_indices = @transform_8, window_bounds = array<i64: 32, 32>}, {pipeline_mode = #tpu.pipeline_mode<synchronous>, transform_indices = @transform_9, window_bounds = array<i64: 32, 128>}, {pipeline_mode = #tpu.pipeline_mode<synchronous>, transform_indices = @transform_10, window_bounds = array<i64: 1, 128>}, {transform_indices = @transform_11, window_bounds = array<i64: 2, 128>}]} {
    %c0 = arith.constant 0 : index
    %c0_0 = arith.constant 0 : index
    %c0_1 = arith.constant 0 : index
    %0 = vector.load %arg1[%c0, %c0_0, %c0_1] : memref<2x8x32xbf16, #tpu.memory_space<vmem>>, vector<2x8x32xbf16>
    %1 = arith.extf %0 : vector<2x8x32xbf16> to vector<2x8x32xf32>
    %c0_2 = arith.constant 0 : index
    %c0_3 = arith.constant 0 : index
    %2 = vector.load %arg5[%c0_2, %c0_3] : memref<9x32xf32, #tpu.memory_space<vmem>>, vector<9x32xf32>
    %3 = vector.shape_cast %1 : vector<2x8x32xf32> to vector<16x32xf32>
    %4 = vector.extract_strided_slice %2 {offsets = [0, 0], sizes = [1, 32], strides = [1, 1]} : vector<9x32xf32> to vector<1x32xf32>
    %5 = vector.extract_strided_slice %2 {offsets = [1, 0], sizes = [1, 32], strides = [1, 1]} : vector<9x32xf32> to vector<1x32xf32>
    %cst = arith.constant dense<0.000000e+00> : vector<16xf32>
    %6 = vector.multi_reduction <add>, %3, %cst [1] : vector<16x32xf32> to vector<16xf32>
    %7 = vector.shape_cast %6 : vector<16xf32> to vector<16x1xf32>
    %cst_4 = arith.constant 3.200000e+01 : f32
    %8 = vector.broadcast %cst_4 : f32 to vector<16x1xf32>
    %9 = arith.divf %7, %8 : vector<16x1xf32>
    %10 = arith.mulf %3, %3 : vector<16x32xf32>
    %cst_5 = arith.constant dense<0.000000e+00> : vector<16xf32>
    %11 = vector.multi_reduction <add>, %10, %cst_5 [1] : vector<16x32xf32> to vector<16xf32>
    %12 = vector.shape_cast %11 : vector<16xf32> to vector<16x1xf32>
    %cst_6 = arith.constant 3.200000e+01 : f32
    %13 = vector.broadcast %cst_6 : f32 to vector<16x1xf32>
    %14 = arith.divf %12, %13 : vector<16x1xf32>
    %15 = arith.mulf %9, %9 : vector<16x1xf32>
    %16 = arith.subf %14, %15 : vector<16x1xf32>
    %cst_7 = arith.constant 0.000000e+00 : f32
    %17 = vector.broadcast %cst_7 : f32 to vector<16x1xf32>
    %18 = arith.maximumf %16, %17 : vector<16x1xf32>
    %19 = vector.broadcast %9 : vector<16x1xf32> to vector<16x32xf32>
    %20 = arith.subf %3, %19 : vector<16x32xf32>
    %cst_8 = arith.constant 9.99999996E-13 : f32
    %21 = vector.broadcast %cst_8 : f32 to vector<16x1xf32>
    %22 = arith.addf %18, %21 : vector<16x1xf32>
    %23 = math.rsqrt %22 : vector<16x1xf32>
    %24 = vector.broadcast %23 : vector<16x1xf32> to vector<16x32xf32>
    %25 = arith.mulf %20, %24 : vector<16x32xf32>
    %26 = vector.broadcast %4 : vector<1x32xf32> to vector<16x32xf32>
    %27 = arith.mulf %25, %26 : vector<16x32xf32>
    %28 = vector.broadcast %5 : vector<1x32xf32> to vector<16x32xf32>
    %29 = arith.addf %27, %28 : vector<16x32xf32>
    %30 = arith.truncf %29 : vector<16x32xf32> to vector<16x32xbf16>
    %c0_9 = arith.constant 0 : index
    %c0_10 = arith.constant 0 : index
    %31 = vector.load %arg2[%c0_9, %c0_10] : memref<32x96xbf16, #tpu.memory_space<vmem>>, vector<32x96xbf16>
    %cst_11 = arith.constant dense<0.000000e+00> : vector<16x96xf32>
    %32 = tpu.matmul %30, %31, %cst_11 {dimension_numbers = #tpu.dot_dimension_numbers<[1], [0], [0], [1], [0, 0, 1, 1], [], []>} : vector<16x32xbf16>, vector<32x96xbf16>, vector<16x96xf32> -> vector<16x96xf32>
    %c0_12 = arith.constant 0 : index
    %c0_13 = arith.constant 0 : index
    %33 = vector.load %arg3[%c0_12, %c0_13] : memref<1x96xf32, #tpu.memory_space<vmem>>, vector<1x96xf32>
    %34 = vector.broadcast %33 : vector<1x96xf32> to vector<16x96xf32>
    %35 = arith.addf %32, %34 : vector<16x96xf32>
    %36 = vector.extract_strided_slice %35 {offsets = [0, 0], sizes = [16, 32], strides = [1, 1]} : vector<16x96xf32> to vector<16x32xf32>
    %37 = vector.shape_cast %36 : vector<16x32xf32> to vector<2x8x32xf32>
    %38 = vector.extract_strided_slice %35 {offsets = [0, 32], sizes = [16, 32], strides = [1, 1]} : vector<16x96xf32> to vector<16x32xf32>
    %39 = vector.shape_cast %38 : vector<16x32xf32> to vector<2x8x32xf32>
    %40 = vector.extract_strided_slice %35 {offsets = [0, 64], sizes = [16, 32], strides = [1, 1]} : vector<16x96xf32> to vector<16x32xf32>
    %41 = vector.shape_cast %40 : vector<16x32xf32> to vector<2x8x32xf32>
    %42 = arith.truncf %37 : vector<2x8x32xf32> to vector<2x8x32xbf16>
    %43 = arith.truncf %39 : vector<2x8x32xf32> to vector<2x8x32xbf16>
    "tpu.trace_start"() <{level = 10 : i32, message = "bqd,bkd->bqk"}> : () -> ()
    %cst_14 = arith.constant dense<0.000000e+00> : vector<2x8x8xf32>
    %44 = tpu.matmul %42, %43, %cst_14 {dimension_numbers = #tpu.dot_dimension_numbers<[2], [2], [1], [1], [0, 0, 0, 1, 1, 1], [0], [0]>} : vector<2x8x32xbf16>, vector<2x8x32xbf16>, vector<2x8x8xf32> -> vector<2x8x8xf32>
    "tpu.trace_stop"() : () -> ()
    %cst_15 = arith.constant dense<0xFF800000> : vector<2x8xf32>
    %45 = vector.multi_reduction <maximumf>, %44, %cst_15 [2] : vector<2x8x8xf32> to vector<2x8xf32>
    %46 = vector.shape_cast %45 : vector<2x8xf32> to vector<2x8x1xf32>
    %47 = vector.broadcast %46 : vector<2x8x1xf32> to vector<2x8x8xf32>
    %48 = arith.subf %44, %47 : vector<2x8x8xf32>
    %49 = math.exp %48 : vector<2x8x8xf32>
    %cst_16 = arith.constant dense<0.000000e+00> : vector<2x8xf32>
    %50 = vector.multi_reduction <add>, %49, %cst_16 [2] : vector<2x8x8xf32> to vector<2x8xf32>
    %51 = vector.shape_cast %50 : vector<2x8xf32> to vector<2x8x1xf32>
    %52 = tpu.reciprocal %51 {approx = true} : vector<2x8x1xf32> -> vector<2x8x1xf32>
    %53 = vector.broadcast %52 : vector<2x8x1xf32> to vector<2x8x8xf32>
    %54 = arith.mulf %49, %53 : vector<2x8x8xf32>
    %55 = arith.truncf %54 : vector<2x8x8xf32> to vector<2x8x8xbf16>
    %56 = arith.truncf %41 : vector<2x8x32xf32> to vector<2x8x32xbf16>
    "tpu.trace_start"() <{level = 10 : i32, message = "bqk,bkd->bqd"}> : () -> ()
    %cst_17 = arith.constant dense<0.000000e+00> : vector<2x8x32xf32>
    %57 = tpu.matmul %55, %56, %cst_17 {dimension_numbers = #tpu.dot_dimension_numbers<[2], [1], [1], [2], [0, 0, 0, 1, 1, 2], [0], [0]>} : vector<2x8x8xbf16>, vector<2x8x32xbf16>, vector<2x8x32xf32> -> vector<2x8x32xf32>
    "tpu.trace_stop"() : () -> ()
    %58 = vector.shape_cast %57 : vector<2x8x32xf32> to vector<16x32xf32>
    %59 = arith.truncf %58 : vector<16x32xf32> to vector<16x32xbf16>
    %c0_18 = arith.constant 0 : index
    %c0_19 = arith.constant 0 : index
    %60 = vector.load %arg4[%c0_18, %c0_19] : memref<32x32xbf16, #tpu.memory_space<vmem>>, vector<32x32xbf16>
    %cst_20 = arith.constant dense<0.000000e+00> : vector<16x32xf32>
    %61 = tpu.matmul %59, %60, %cst_20 {dimension_numbers = #tpu.dot_dimension_numbers<[1], [0], [0], [1], [0, 0, 1, 1], [], []>} : vector<16x32xbf16>, vector<32x32xbf16>, vector<16x32xf32> -> vector<16x32xf32>
    %62 = vector.extract_strided_slice %2 {offsets = [6, 0], sizes = [1, 32], strides = [1, 1]} : vector<9x32xf32> to vector<1x32xf32>
    %63 = vector.broadcast %62 : vector<1x32xf32> to vector<16x32xf32>
    %64 = arith.addf %61, %63 : vector<16x32xf32>
    %65 = arith.addf %29, %64 : vector<16x32xf32>
    %66 = vector.extract_strided_slice %2 {offsets = [2, 0], sizes = [1, 32], strides = [1, 1]} : vector<9x32xf32> to vector<1x32xf32>
    %67 = vector.extract_strided_slice %2 {offsets = [3, 0], sizes = [1, 32], strides = [1, 1]} : vector<9x32xf32> to vector<1x32xf32>
    %cst_21 = arith.constant dense<0.000000e+00> : vector<16xf32>
    %68 = vector.multi_reduction <add>, %65, %cst_21 [1] : vector<16x32xf32> to vector<16xf32>
    %69 = vector.shape_cast %68 : vector<16xf32> to vector<16x1xf32>
    %cst_22 = arith.constant 3.200000e+01 : f32
    %70 = vector.broadcast %cst_22 : f32 to vector<16x1xf32>
    %71 = arith.divf %69, %70 : vector<16x1xf32>
    %72 = arith.mulf %65, %65 : vector<16x32xf32>
    %cst_23 = arith.constant dense<0.000000e+00> : vector<16xf32>
    %73 = vector.multi_reduction <add>, %72, %cst_23 [1] : vector<16x32xf32> to vector<16xf32>
    %74 = vector.shape_cast %73 : vector<16xf32> to vector<16x1xf32>
    %cst_24 = arith.constant 3.200000e+01 : f32
    %75 = vector.broadcast %cst_24 : f32 to vector<16x1xf32>
    %76 = arith.divf %74, %75 : vector<16x1xf32>
    %77 = arith.mulf %71, %71 : vector<16x1xf32>
    %78 = arith.subf %76, %77 : vector<16x1xf32>
    %cst_25 = arith.constant 0.000000e+00 : f32
    %79 = vector.broadcast %cst_25 : f32 to vector<16x1xf32>
    %80 = arith.maximumf %78, %79 : vector<16x1xf32>
    %81 = vector.broadcast %71 : vector<16x1xf32> to vector<16x32xf32>
    %82 = arith.subf %65, %81 : vector<16x32xf32>
    %cst_26 = arith.constant 9.99999996E-13 : f32
    %83 = vector.broadcast %cst_26 : f32 to vector<16x1xf32>
    %84 = arith.addf %80, %83 : vector<16x1xf32>
    %85 = math.rsqrt %84 : vector<16x1xf32>
    %86 = vector.broadcast %85 : vector<16x1xf32> to vector<16x32xf32>
    %87 = arith.mulf %82, %86 : vector<16x32xf32>
    %88 = vector.broadcast %66 : vector<1x32xf32> to vector<16x32xf32>
    %89 = arith.mulf %87, %88 : vector<16x32xf32>
    %90 = vector.broadcast %67 : vector<1x32xf32> to vector<16x32xf32>
    %91 = arith.addf %89, %90 : vector<16x32xf32>
    %92 = arith.truncf %91 : vector<16x32xf32> to vector<16x32xbf16>
    %c0_27 = arith.constant 0 : index
    %c0_28 = arith.constant 0 : index
    %93 = vector.load %arg6[%c0_27, %c0_28] : memref<32x64xbf16, #tpu.memory_space<vmem>>, vector<32x64xbf16>
    %cst_29 = arith.constant dense<0.000000e+00> : vector<16x64xf32>
    %94 = tpu.matmul %92, %93, %cst_29 {dimension_numbers = #tpu.dot_dimension_numbers<[1], [0], [0], [1], [0, 0, 1, 1], [], []>} : vector<16x32xbf16>, vector<32x64xbf16>, vector<16x64xf32> -> vector<16x64xf32>
    %c0_30 = arith.constant 0 : index
    %c0_31 = arith.constant 0 : index
    %95 = vector.load %arg7[%c0_30, %c0_31] : memref<1x64xf32, #tpu.memory_space<vmem>>, vector<1x64xf32>
    %96 = vector.broadcast %95 : vector<1x64xf32> to vector<16x64xf32>
    %97 = arith.addf %94, %96 : vector<16x64xf32>
    %cst_32 = arith.constant 5.000000e-01 : f32
    %98 = vector.broadcast %cst_32 : f32 to vector<16x64xf32>
    %99 = arith.mulf %98, %97 : vector<16x64xf32>
    %cst_33 = arith.constant 4.471500e-02 : f32
    %100 = vector.broadcast %cst_33 : f32 to vector<16x64xf32>
    %101 = arith.mulf %100, %97 : vector<16x64xf32>
    %102 = arith.mulf %101, %97 : vector<16x64xf32>
    %103 = arith.mulf %102, %97 : vector<16x64xf32>
    %104 = arith.addf %97, %103 : vector<16x64xf32>
    %cst_34 = arith.constant 0.797884583 : f32
    %105 = vector.broadcast %cst_34 : f32 to vector<16x64xf32>
    %106 = arith.mulf %105, %104 : vector<16x64xf32>
    %107 = math.tanh %106 : vector<16x64xf32>
    %cst_35 = arith.constant 1.000000e+00 : f32
    %108 = vector.broadcast %cst_35 : f32 to vector<16x64xf32>
    %109 = arith.addf %108, %107 : vector<16x64xf32>
    %110 = arith.mulf %99, %109 : vector<16x64xf32>
    %111 = arith.truncf %110 : vector<16x64xf32> to vector<16x64xbf16>
    %c0_36 = arith.constant 0 : index
    %c0_37 = arith.constant 0 : index
    %112 = vector.load %arg8[%c0_36, %c0_37] : memref<64x32xbf16, #tpu.memory_space<vmem>>, vector<64x32xbf16>
    %cst_38 = arith.constant dense<0.000000e+00> : vector<16x32xf32>
    %113 = tpu.matmul %111, %112, %cst_38 {dimension_numbers = #tpu.dot_dimension_numbers<[1], [0], [0], [1], [0, 0, 1, 1], [], []>} : vector<16x64xbf16>, vector<64x32xbf16>, vector<16x32xf32> -> vector<16x32xf32>
    %114 = vector.extract_strided_slice %2 {offsets = [7, 0], sizes = [1, 32], strides = [1, 1]} : vector<9x32xf32> to vector<1x32xf32>
    %115 = vector.broadcast %114 : vector<1x32xf32> to vector<16x32xf32>
    %116 = arith.addf %113, %115 : vector<16x32xf32>
    %117 = arith.addf %91, %116 : vector<16x32xf32>
    %118 = vector.extract_strided_slice %2 {offsets = [4, 0], sizes = [1, 32], strides = [1, 1]} : vector<9x32xf32> to vector<1x32xf32>
    %119 = vector.extract_strided_slice %2 {offsets = [5, 0], sizes = [1, 32], strides = [1, 1]} : vector<9x32xf32> to vector<1x32xf32>
    %cst_39 = arith.constant dense<0.000000e+00> : vector<16xf32>
    %120 = vector.multi_reduction <add>, %117, %cst_39 [1] : vector<16x32xf32> to vector<16xf32>
    %121 = vector.shape_cast %120 : vector<16xf32> to vector<16x1xf32>
    %cst_40 = arith.constant 3.200000e+01 : f32
    %122 = vector.broadcast %cst_40 : f32 to vector<16x1xf32>
    %123 = arith.divf %121, %122 : vector<16x1xf32>
    %124 = arith.mulf %117, %117 : vector<16x32xf32>
    %cst_41 = arith.constant dense<0.000000e+00> : vector<16xf32>
    %125 = vector.multi_reduction <add>, %124, %cst_41 [1] : vector<16x32xf32> to vector<16xf32>
    %126 = vector.shape_cast %125 : vector<16xf32> to vector<16x1xf32>
    %cst_42 = arith.constant 3.200000e+01 : f32
    %127 = vector.broadcast %cst_42 : f32 to vector<16x1xf32>
    %128 = arith.divf %126, %127 : vector<16x1xf32>
    %129 = arith.mulf %123, %123 : vector<16x1xf32>
    %130 = arith.subf %128, %129 : vector<16x1xf32>
    %cst_43 = arith.constant 0.000000e+00 : f32
    %131 = vector.broadcast %cst_43 : f32 to vector<16x1xf32>
    %132 = arith.maximumf %130, %131 : vector<16x1xf32>
    %133 = vector.broadcast %123 : vector<16x1xf32> to vector<16x32xf32>
    %134 = arith.subf %117, %133 : vector<16x32xf32>
    %cst_44 = arith.constant 9.99999996E-13 : f32
    %135 = vector.broadcast %cst_44 : f32 to vector<16x1xf32>
    %136 = arith.addf %132, %135 : vector<16x1xf32>
    %137 = math.rsqrt %136 : vector<16x1xf32>
    %138 = vector.broadcast %137 : vector<16x1xf32> to vector<16x32xf32>
    %139 = arith.mulf %134, %138 : vector<16x32xf32>
    %140 = vector.broadcast %118 : vector<1x32xf32> to vector<16x32xf32>
    %141 = arith.mulf %139, %140 : vector<16x32xf32>
    %142 = vector.broadcast %119 : vector<1x32xf32> to vector<16x32xf32>
    %143 = arith.addf %141, %142 : vector<16x32xf32>
    %144 = vector.shape_cast %143 : vector<16x32xf32> to vector<2x8x32xf32>
    %145 = vector.extract_strided_slice %144 {offsets = [0, 0, 0], sizes = [2, 1, 32], strides = [1, 1, 1]} : vector<2x8x32xf32> to vector<2x1x32xf32>
    %146 = vector.shape_cast %145 : vector<2x1x32xf32> to vector<2x32xf32>
    %147 = arith.truncf %146 : vector<2x32xf32> to vector<2x32xbf16>
    %c0_45 = arith.constant 0 : index
    %c0_46 = arith.constant 0 : index
    %148 = vector.load %arg9[%c0_45, %c0_46] : memref<32x32xbf16, #tpu.memory_space<vmem>>, vector<32x32xbf16>
    %cst_47 = arith.constant dense<0.000000e+00> : vector<2x32xf32>
    %149 = tpu.matmul %147, %148, %cst_47 {dimension_numbers = #tpu.dot_dimension_numbers<[1], [0], [0], [1], [0, 0, 1, 1], [], []>} : vector<2x32xbf16>, vector<32x32xbf16>, vector<2x32xf32> -> vector<2x32xf32>
    %150 = vector.extract_strided_slice %2 {offsets = [8, 0], sizes = [1, 32], strides = [1, 1]} : vector<9x32xf32> to vector<1x32xf32>
    %151 = vector.broadcast %150 : vector<1x32xf32> to vector<2x32xf32>
    %152 = arith.addf %149, %151 : vector<2x32xf32>
    %153 = math.tanh %152 : vector<2x32xf32>
    %154 = arith.truncf %153 : vector<2x32xf32> to vector<2x32xbf16>
    %c0_48 = arith.constant 0 : index
    %c0_49 = arith.constant 0 : index
    %155 = vector.load %arg10[%c0_48, %c0_49] : memref<32x128xbf16, #tpu.memory_space<vmem>>, vector<32x128xbf16>
    %cst_50 = arith.constant dense<0.000000e+00> : vector<2x128xf32>
    %156 = tpu.matmul %154, %155, %cst_50 {dimension_numbers = #tpu.dot_dimension_numbers<[1], [0], [0], [1], [0, 0, 1, 1], [], []>} : vector<2x32xbf16>, vector<32x128xbf16>, vector<2x128xf32> -> vector<2x128xf32>
    %c0_51 = arith.constant 0 : index
    %c0_52 = arith.constant 0 : index
    %157 = vector.load %arg11[%c0_51, %c0_52] : memref<1x128xf32, #tpu.memory_space<vmem>>, vector<1x128xf32>
    %158 = vector.broadcast %157 : vector<1x128xf32> to vector<2x128xf32>
    %159 = arith.addf %156, %158 : vector<2x128xf32>
    %c0_53 = arith.constant 0 : index
    %c0_54 = arith.constant 0 : index
    %160 = vector.load %arg12[%c0_53, %c0_54] : memref<2x128xf32, #tpu.memory_space<vmem>>, vector<2x128xf32>
    tpu.vector_store %arg12[%c0_53, %c0_54], %159 {strides = array<i32>} : memref<2x128xf32, #tpu.memory_space<vmem>>, vector<2x128xf32>,
    return
  }
  func.func @transform_0(%arg0: i32) -> (i32, i32, i32) {
    %c0_i32 = arith.constant 0 : i32
    %c0_i32_0 = arith.constant 0 : i32
    %c0_i32_1 = arith.constant 0 : i32
    return %arg0, %c0_i32, %c0_i32_0 : i32, i32, i32
  }
  func.func @transform_1(%arg0: i32) -> (i32, i32) {
    %c0_i32 = arith.constant 0 : i32
    %c0_i32_0 = arith.constant 0 : i32
    %c0_i32_1 = arith.constant 0 : i32
    return %c0_i32, %c0_i32_0 : i32, i32
  }
  func.func @transform_2(%arg0: i32) -> (i32, i32) {
    %c0_i32 = arith.constant 0 : i32
    %c0_i32_0 = arith.constant 0 : i32
    %c0_i32_1 = arith.constant 0 : i32
    return %c0_i32, %c0_i32_0 : i32, i32
  }
  func.func @transform_3(%arg0: i32) -> (i32, i32) {
    %c0_i32 = arith.constant 0 : i32
    %c0_i32_0 = arith.constant 0 : i32
    %c0_i32_1 = arith.constant 0 : i32
    return %c0_i32, %c0_i32_0 : i32, i32
  }
  func.func @transform_4(%arg0: i32) -> (i32, i32) {
    %c0_i32 = arith.constant 0 : i32
    %c0_i32_0 = arith.constant 0 : i32
    %c0_i32_1 = arith.constant 0 : i32
    return %c0_i32, %c0_i32_0 : i32, i32
  }
  func.func @transform_5(%arg0: i32) -> (i32, i32) {
    %c0_i32 = arith.constant 0 : i32
    %c0_i32_0 = arith.constant 0 : i32
    %c0_i32_1 = arith.constant 0 : i32
    return %c0_i32, %c0_i32_0 : i32, i32
  }
  func.func @transform_6(%arg0: i32) -> (i32, i32) {
    %c0_i32 = arith.constant 0 : i32
    %c0_i32_0 = arith.constant 0 : i32
    %c0_i32_1 = arith.constant 0 : i32
    return %c0_i32, %c0_i32_0 : i32, i32
  }
  func.func @transform_7(%arg0: i32) -> (i32, i32) {
    %c0_i32 = arith.constant 0 : i32
    %c0_i32_0 = arith.constant 0 : i32
    %c0_i32_1 = arith.constant 0 : i32
    return %c0_i32, %c0_i32_0 : i32, i32
  }
  func.func @transform_8(%arg0: i32) -> (i32, i32) {
    %c0_i32 = arith.constant 0 : i32
    %c0_i32_0 = arith.constant 0 : i32
    %c0_i32_1 = arith.constant 0 : i32
    return %c0_i32, %c0_i32_0 : i32, i32
  }
  func.func @transform_9(%arg0: i32) -> (i32, i32) {
    %c0_i32 = arith.constant 0 : i32
    %c0_i32_0 = arith.constant 0 : i32
    %c0_i32_1 = arith.constant 0 : i32
    return %c0_i32, %c0_i32_0 : i32, i32
  }
  func.func @transform_10(%arg0: i32) -> (i32, i32) {
    %c0_i32 = arith.constant 0 : i32
    %c0_i32_0 = arith.constant 0 : i32
    %c0_i32_1 = arith.constant 0 : i32
    return %c0_i32, %c0_i32_0 : i32, i32
  }
  func.func @transform_11(%arg0: i32) -> (i32, i32) {
    %c0_i32 = arith.constant 0 : i32
    %c0_i32_0 = arith.constant 0 : i32
    return %arg0, %c0_i32 : i32, i32
  }
}

</mosaic_0001>

<bundles_post_ra>
// kernel: tpu_custom_call.1
= control target key start
LH: loop header
LB: loop body
LE: loop exit
PB: predicated region body
PF: predicated region fallthrough
CT: control target
= control target key end

     0   :  { %16 = vsyncpa [#allocation3], 0  ;;  %s1148_s0 = inlined_call_operand.hbm [shape: bf16[2,8,32], index: 0, kind: input, shape index: {}]   ;;  %s1149_s1 = inlined_call_operand.vmem [shape: bf16[32,96], index: 1, kind: input, shape index: {}]   ;;  %s1150_s2 = inlined_call_operand.vmem [shape: f32[1,96], index: 2, kind: input, shape index: {}]   ;;  %s1151_s3 = inlined_call_operand.vmem [shape: bf16[32,32], index: 3, kind: input, shape index: {}]   ;;  %s1152_s4 = inlined_call_operand.vmem [shape: f32[9,32], index: 4, kind: input, shape index: {}]   ;;  %s1153_s5 = inlined_call_operand.hbm [shape: bf16[32,64], index: 5, kind: input, shape index: {}]   ;;  %s1154_s6 = inlined_call_operand.vmem [shape: f32[1,64], index: 6, kind: input, shape index: {}]   ;;  %s1155_s7 = inlined_call_operand.vmem [shape: bf16[64,32], index: 7, kind: input, shape index: {}]   ;;  %s1156_s8 = inlined_call_operand.hbm [shape: bf16[32,32], index: 8, kind: input, shape index: {}]   ;;  %s1157_s9 = inlined_call_operand.hbm [shape: bf16[32,128], index: 9, kind: input, shape index: {}]   ;;  %s1158_s10 = inlined_call_operand.vmem [shape: f32[1,128], index: 10, kind: input, shape index: {}]   ;;  %s1159_s11 = inlined_call_operand.hbm [shape: f32[2,128], index: 11, kind: output, shape index: {}]  }
   0x1   :  { %17 = vsyncpa [#allocation6], 0 }
   0x2   :  { %18 = vsyncpa [#allocation9], 0 }
   0x3   :  { %19 = vsyncpa [#allocation4], 0  ;;  %s45_s19 = sshll.u32 %s1153_s5, 4  ;;  %s942_s20 = smov [#allocation5]   ;;  %s46_s19 = int_to_ptr.hbm [resolvable:$true] %s45_s19 }
   0x4   :  { %s47_s21 = sshll.u32 %s942_s20, 4  ;;  %s24_s24 = sshll.u32 %s1148_s0, 4  ;;  %s48_s21 = int_to_ptr.vmem [resolvable:$true] %s47_s21  ;;  %s25_s24 = int_to_ptr.hbm [resolvable:$true] %s24_s24 }
   0x5   :  { %s943_s25 = smov 64   ;;  %s944_s26 = smov 4  }
   0x6   :  { %53 = dma.hbm_to_vmem [thread:$0]  %s46_s19, 256, %s48_s21, [#allocation6], %s943_s25, %s943_s25, %s944_s26  }
   0x7   :  { %s945_s27 = smov [#allocation2]   ;;  %s62_s5 = sshll.u32 %s1156_s8, 4  ;;  %s63_s5 = int_to_ptr.hbm [resolvable:$true] %s62_s5 }
   0x8   :  { %s26_s28 = sshll.u32 %s945_s27, 4  ;;  %s75_s0 = sshll.u32 %s1157_s9, 4  ;;  %s27_s28 = int_to_ptr.vmem [resolvable:$true] %s26_s28  ;;  %s76_s0 = int_to_ptr.hbm [resolvable:$true] %s75_s0 }
   0x9   :  { %32 = dma.hbm_to_vmem [thread:$0]  %s25_s24, 128, %s27_s28, [#allocation3], %s943_s25, %s943_s25, %s944_s26  }
   0xa   :  { %s946_s14 = smov [#allocation7]   ;;  %s947_s16 = smov [#allocation8]  }
   0xb   :  { %s64_s15 = sshll.u32 %s946_s14, 4  ;;  %s77_s17 = sshll.u32 %s947_s16, 4  ;;  %s65_s15 = int_to_ptr.vmem [resolvable:$true] %s64_s15  ;;  %s78_s17 = int_to_ptr.vmem [resolvable:$true] %s77_s17 }
   0xc   :  { %70 = dma.hbm_to_vmem [thread:$0]  %s63_s5, 256, %s65_s15, [#allocation6], %s943_s25, %s943_s25, %s944_s26  }
   0xd   :  { %83 = dma.hbm_to_vmem [thread:$0]  %s76_s0, 256, %s78_s17, [#allocation9], %s943_s25, %s943_s25, %s944_s26  }
   0xe   :  { %934 = dma.done.wait [#allocation3], 128  }
   0xf   :  { %935 = vsyncadd [#allocation3], 4294967168 }
  0x10   :  { %936 = dma.done.wait [#allocation6], 512  }
  0x11   :  { %937 = vsyncadd [#allocation6], 4294966784 }
  0x12   :  { %938 = dma.done.wait [#allocation9], 256  }
  0x13   :  { %939 = vsyncadd [#allocation9], 4294967040  ;;  %v770_v0 = vld [vmem:[#allocation2] sm:$0xff]   ;;  %vm109_vm0 = vcmask 261120   ;;  %v948_v9 = vmov 32.0   ;;  %v756_v21 = vld [vmem:[%s1149_s1 + $0x8] sm:$0xff] }
  0x14   :  { %v771_v1 = vunpack.c.l.bf16 %v770_v0  ;;  %v1032_v4 = vunpack.c.h.bf16 %v770_v0  ;;  %786 = vrcp.f32 %v948_v9  ;;  %203 = vmatpush.bf16.msra.mxu0 %v756_v21  ;;  %v755_v23 = vld [vmem:[%s1149_s1] sm:$0xff]  ;;  %s949_s23 = smov 96   ;;  %vm261_vm8 = vcmask 64512   ;;  %s950_s17 = smov [#allocation10]  }
  0x15   :  { %v1055_v44 = vld [vmem:[%s1152_s4] sm:$0xff]  ;;  %vm291_vm9 = vcmask 1043456   ;;  %s675_s8 = sshll.u32 %s950_s17, 4  ;;  %s677_s19 = sshll.u32 %s1159_s11, 4  ;;  %s676_s8 = int_to_ptr.vmem [resolvable:$true] %s675_s8  ;;  %s678_s19 = int_to_ptr.hbm [resolvable:$true] %s677_s19 }
  0x16   :  { %v110_v2 = vsel %vm109_vm0, %v771_v1, 0.0  ;;  %v125_v3 = vmul.f32 %v771_v1, %v771_v1  ;;  %v126_v6 = vmul.f32 %v1032_v4, %v1032_v4  ;;  %v113_v7 = vsel %vm109_vm0, %v1032_v4, 0.0  ;;  %v782_v60 = vld [vmem:[%s1150_s2] ss:$0 sm:$0xff] }
  0x17   :  { %111 = vadd.xlane.f32.xlu0 %v110_v2  ;;  %v167_v49 = vperm.slane %v1055_v44, 0  ;;  %v170_v55 = vperm.slane %v1055_v44, 1 }
  0x18   :  { %v127_v5 = vsel %vm109_vm0, %v125_v3, 0.0  ;;  %v130_v8 = vsel %vm109_vm0, %v126_v6, 0.0  ;;  %204 = vmatpush.bf16.msra.mxu0 %v755_v23 }
  0x19   :  { %128 = vadd.xlane.f32.xlu1 %v127_v5 }
  0x1a   :  { %v787_v10 = vpop.eup %786 }
  0x1b   :  { %v117_v11 = vmul.f32 32.0, %v787_v10  ;;  %vm121_vm1 = vweird.f32 %v787_v10 }
  0x1d   :  { %v118_v12 = vsub.f32 1.0, %v117_v11 }
  0x1f   :  { %114 = vadd.xlane.f32.xlu0 %v113_v7  ;;  %v119_v13 = vmul.f32 %v787_v10, %v118_v12 }
  0x21   :  { %131 = vadd.xlane.f32.xlu1 %v130_v8  ;;  %v120_v14 = vadd.f32 %v787_v10, %v119_v13 }
  0x23   :  { %v1040_v15 = vsel %vm121_vm1, %v787_v10, %v120_v14  ;;  %vm512_vm1 = vcmask 523264  }
  0x8a   :  { %v112_v16 = vpop.xlane.xlu0 %111 }
  0x8b   :  { %v123_v17 = vmul.f32 %v1040_v15, %v112_v16 }
  0x8c   :  { %v129_v18 = vpop.xlane.xlu1 %128 }
  0x8d   :  { %v135_v19 = vmul.f32 %v123_v17, %v123_v17  ;;  %v133_v20 = vmul.f32 %v129_v18, %v1040_v15  ;;  %v141_v46 = vsub.f32 %v771_v1, %v123_v17 }
  0x8f   :  { %v137_v22 = vsub.f32 %v133_v20, %v135_v19 }
  0x91   :  { %v139_v24 = vmax.f32 %v137_v22, 0.0 }
  0x92   :  { %v115_v25 = vpop.xlane.xlu0 %114 }
  0x93   :  { %v143_v26 = vadd.f32 1e-12, %v139_v24  ;;  %v124_v27 = vmul.f32 %v1040_v15, %v115_v25 }
  0x94   :  { %v132_v28 = vpop.xlane.xlu1 %131 }
  0x95   :  { %788 = vrsqrt.f32 %v143_v26  ;;  %v136_v29 = vmul.f32 %v124_v27, %v124_v27  ;;  %v134_v30 = vmul.f32 %v132_v28, %v1040_v15  ;;  %vm151_vm3 = vweird.f32 %v143_v26 }
  0x96   :  { %v142_v51 = vsub.f32 %v1032_v4, %v124_v27 }
  0x97   :  { %v138_v31 = vsub.f32 %v134_v30, %v136_v29 }
  0x99   :  { %v140_v32 = vmax.f32 %v138_v31, 0.0 }
  0x9b   :  { %v789_v33 = vpop.eup %788  ;;  %v144_v35 = vadd.f32 1e-12, %v140_v32 }
  0x9c   :  { %v146_v34 = vmul.f32 %v789_v33, %v143_v26  ;;  %vm152_vm2 = vweird.f32 %v789_v33 }
  0x9d   :  { %790 = vrsqrt.f32 %v144_v35  ;;  %vm153_vm4 = vmor %vm151_vm3, %vm152_vm2  ;;  %vm161_vm6 = vweird.f32 %v144_v35 }
  0x9e   :  { %v147_v36 = vmul.f32 %v789_v33, %v146_v34 }
  0xa0   :  { %v148_v37 = vmul.f32 0.5, %v147_v36 }
  0xa2   :  { %v149_v38 = vsub.f32 1.5, %v148_v37 }
  0xa3   :  { %v791_v39 = vpop.eup %790 }
  0xa4   :  { %v150_v40 = vmul.f32 %v789_v33, %v149_v38  ;;  %v156_v41 = vmul.f32 %v791_v39, %v144_v35  ;;  %vm162_vm5 = vweird.f32 %v791_v39 }
  0xa5   :  { %vm163_vm7 = vmor %vm161_vm6, %vm162_vm5 }
  0xa6   :  { %v157_v42 = vmul.f32 %v791_v39, %v156_v41  ;;  %v154_v45 = vsel %vm153_vm4, %v789_v33, %v150_v40  ;;  %v758_v40 = vld [vmem:[%s1151_s3 + $0x8] sm:$0xff]  ;;  %v757_v41 = vld [vmem:[%s1151_s3] sm:$0xff] }
  0xa7   :  { %v165_v48 = vmul.f32 %v154_v45, %v141_v46  ;;  %356 = vmatpush.bf16.msrb.mxu0 %v758_v40 }
  0xa8   :  { %v158_v43 = vmul.f32 0.5, %v157_v42 }
  0xa9   :  { %v168_v54 = vmul.f32 %v167_v49, %v165_v48  ;;  %v334_v48 = vperm.slane %v1055_v44, 6 }
  0xaa   :  { %v159_v47 = vsub.f32 1.5, %v158_v43 }
  0xab   :  { %v1060_v57 = vadd.f32 %v170_v55, %v168_v54  ;;  %357 = vmatpush.bf16.msrb.mxu0 %v757_v41  ;;  %v764_v41 = vld [vmem:[%s1155_s7 + $0x18] sm:$0xff] }
  0xac   :  { %v160_v50 = vmul.f32 %v791_v39, %v159_v47 }
  0xae   :  { %v164_v52 = vsel %vm163_vm7, %v791_v39, %v160_v50 }
  0xaf   :  { %v166_v53 = vmul.f32 %v164_v52, %v142_v51 }
  0xb1   :  { %v169_v56 = vmul.f32 %v167_v49, %v166_v53 }
  0xb3   :  { %v1062_v58 = vadd.f32 %v170_v55, %v169_v56 }
  0xb5   :  { %v173_v59 = vpack.c.bf16 %v1062_v58, %v1060_v57 }
  0xb7   :  { %697 = vmatmul.msk.bf16.vlgmr.msra.gmra.mxu0 %vm109_vm0, %v173_v59 }
 0x134   :  { %v206_v61 = vpop.f32.mrf.mxu0 }
 0x135   :  { %v207_v62 = vadd.f32 %v782_v60, %v206_v61 }
 0x137   :  { %v211_v63 = vpack.c.bf16 %v207_v62, %v207_v62 }
 0x139   :  { %v214_v0 = vunpack.c.l.b16 %v211_v63 }
 0x13b   :  { %v215_v1 = vpack.c.b16 %v214_v0, %v214_v0 }
 0x13c   :  { %v208_v2 = vpop.f32.mrf.mxu0 }
 0x13d   :  { %v209_v3 = vadd.f32 %v782_v60, %v208_v2  ;;  %216 = vrot.lane.b32.xlu2 %v215_v1, %s949_s23 }
 0x13f   :  { %v212_v4 = vpack.c.bf16 %v209_v3, %v209_v3 }
 0x141   :  { %v238_v5 = vunpack.c.l.b16 %v212_v4 }
 0x143   :  { %v239_v6 = vpack.c.b16 %v238_v5, %v238_v5 }
 0x145   :  { %240 = vrot.lane.b32.xlu2 %v239_v6, %s949_s23 }
 0x197   :  { %v217_v7 = vpop.permute.xlu2 %216 }
 0x198   :  { %v222_v8 = vsel %vm109_vm0, %v217_v7, 0 }
 0x199   :  { %231 = vmatpush.bf16.xpose.msra.mxu1 %v222_v8 }
 0x19f   :  { %v241_v9 = vpop.permute.xlu2 %240 }
 0x1a0   :  { %698 = vmatmul.msk.bf16.vlgmr.msra.gmra.mxu1 %vm109_vm0, %v211_v63  ;;  %v246_v10 = vsel %vm109_vm0, %v241_v9, 0 }
 0x1a1   :  { %255 = vmatpush.bf16.xpose.msra.mxu2 %v246_v10 }
 0x1a8   :  { %699 = vmatmul.msk.bf16.vlgmr.msra.gmra.mxu2 %vm109_vm0, %v212_v4  ;;  %v760_v4 = vld [vmem:[#allocation5 + $0x8] sm:$0xff] }
 0x1a9   :  { %452 = vmatpush.bf16.msrb.mxu1 %v760_v4  ;;  %520 = vmatpush.bf16.msrb.mxu2 %v764_v41 }
 0x21d   :  { %v233_v11 = vpop.f32.mrf.mxu1 }
 0x21e   :  { %v262_v12 = vsel %vm261_vm8, %v233_v11, -inf }
 0x21f   :  { %263 = vmax.xlane.f32.xlu0 %v262_v12 }
 0x225   :  { %v235_v13 = vpop.f32.mrf.mxu1 }
 0x22b   :  { %v257_v14 = vpop.f32.mrf.mxu2 }
 0x22c   :  { %v265_v16 = vsel %vm261_vm8, %v257_v14, -inf }
 0x22d   :  { %266 = vmax.xlane.f32.xlu1 %v265_v16 }
 0x233   :  { %286 = vrot.lane.b32.xlu0 %v215_v1, %s943_s25  ;;  %v259_v17 = vpop.f32.mrf.mxu2 }
 0x292   :  { %v264_v18 = vpop.xlane.xlu0 %263 }
 0x293   :  { %v268_v19 = vsub.f32 %v233_v11, %v264_v18 }
 0x295   :  { %v270_v20 = vmul.f32 1.442695, %v268_v19 }
 0x297   :  { %792 = vpow2.f32 %v270_v20 }
 0x29d   :  { %v793_v21 = vpop.eup %792 }
 0x29e   :  { %v274_v22 = vsel %vm261_vm8, %v793_v21, 0.0 }
 0x29f   :  { %275 = vadd.xlane.f32.xlu2 %v274_v22 }
 0x2a0   :  { %v267_v23 = vpop.xlane.xlu1 %266 }
 0x2a1   :  { %v269_v24 = vsub.f32 %v257_v14, %v267_v23 }
 0x2a3   :  { %v272_v25 = vmul.f32 1.442695, %v269_v24 }
 0x2a5   :  { %794 = vpow2.f32 %v272_v25  ;;  %v287_v26 = vpop.permute.xlu0 %286 }
 0x2a6   :  { %v293_v27 = vsel %vm291_vm9, %v287_v26, 0 }
 0x2a7   :  { %302 = vmatpush.bf16.msra.mxu3 %v293_v27 }
 0x2ab   :  { %v795_v28 = vpop.eup %794 }
 0x2ac   :  { %v277_v29 = vsel %vm261_vm8, %v795_v28, 0.0 }
 0x2ad   :  { %278 = vadd.xlane.f32.xlu1 %v277_v29 }
 0x2c6   :  { %308 = vrot.lane.b32.xlu1 %v239_v6, %s943_s25  ;;  %v759_v6 = vld [vmem:[#allocation5] sm:$0xff] }
 0x2c7   :  { %453 = vmatpush.bf16.msrb.mxu1 %v759_v6 }
 0x312   :  { %v276_v30 = vpop.xlane.xlu2 %275 }
 0x313   :  { %796 = vrcp.f32 %v276_v30  ;;  %v416_v30 = vperm.slane %v1055_v44, 2 }
 0x319   :  { %v797_v31 = vpop.eup %796 }
 0x31a   :  { %v282_v32 = vmul.f32 %v797_v31, %v793_v21 }
 0x31c   :  { %v284_v33 = vpack.c.bf16 %v282_v32, %v282_v32 }
 0x31e   :  { %700 = vmatmul.msk.bf16.vlgmr.msra.gmra.mxu3 %vm261_vm8, %v284_v33 }
 0x320   :  { %v279_v34 = vpop.xlane.xlu1 %278 }
 0x321   :  { %798 = vrcp.f32 %v279_v34 }
 0x327   :  { %v799_v35 = vpop.eup %798 }
 0x328   :  { %v283_v36 = vmul.f32 %v799_v35, %v795_v28 }
 0x32a   :  { %v285_v39 = vpack.c.bf16 %v283_v36, %v283_v36  ;;  %v419_v36 = vperm.slane %v1055_v44, 3 }
 0x338   :  { %v309_v37 = vpop.permute.xlu1 %308 }
 0x339   :  { %v314_v38 = vsel %vm291_vm9, %v309_v37, 0 }
 0x33a   :  { %323 = vmatpush.bf16.msrb.mxu3 %v314_v38 }
 0x33d   :  { %701 = vmatmul.msk.bf16.vlgmr.msrb.gmra.mxu3 %vm261_vm8, %v285_v39  ;;  %vm600_vm8 = vcmask 1041409  }
 0x3a1   :  { %v304_v42 = vpop.f32.mrf.mxu3 }
 0x3a9   :  { %v306_v43 = vpop.f32.mrf.mxu3 }
 0x3aa   :  { %v762_v43 = vld [vmem:[%s1155_s7 + $0x8] sm:$0xff] }
 0x3c0   :  { %v325_v45 = vpop.f32.mrf.mxu3 }
 0x3c1   :  { %v329_v46 = vpack.c.bf16 %v325_v45, %v304_v42  ;;  %v763_v42 = vld [vmem:[%s1155_s7 + $0x10] sm:$0xff]  ;;  %v761_v45 = vld [vmem:[%s1155_s7] sm:$0xff] }
 0x3c2   :  { %521 = vmatpush.bf16.msrb.mxu2 %v763_v42 }
 0x3c3   :  { %710 = vmatmul.msk.bf16.vlgmr.msrb.gmra.mxu0 %vm109_vm0, %v329_v46  ;;  %v783_v46 = vld [vmem:[%s1154_s6] ss:$0 sm:$0xff] }
 0x3c6   :  { %522 = vmatpush.bf16.msrb.mxu2 %v762_v43 }
 0x3c8   :  { %v327_v47 = vpop.f32.mrf.mxu3 }
 0x3ca   :  { %523 = vmatpush.bf16.msrb.mxu2 %v761_v45 }
 0x440   :  { %v359_v49 = vpop.f32.mrf.mxu0 }
 0x441   :  { %v360_v50 = vadd.f32 %v359_v49, %v334_v48 }
 0x443   :  { %v364_v51 = vadd.f32 %v360_v50, %v1060_v57 }
 0x445   :  { %v366_v52 = vsel %vm109_vm0, %v364_v51, 0.0  ;;  %v374_v53 = vmul.f32 %v364_v51, %v364_v51 }
 0x446   :  { %367 = vadd.xlane.f32.xlu0 %v366_v52 }
 0x447   :  { %v376_v54 = vsel %vm109_vm0, %v374_v53, 0.0 }
 0x448   :  { %v361_v55 = vpop.f32.mrf.mxu0  ;;  %377 = vadd.xlane.f32.xlu2 %v376_v54 }
 0x449   :  { %v362_v56 = vadd.f32 %v361_v55, %v334_v48 }
 0x44b   :  { %v365_v59 = vadd.f32 %v362_v56, %v1062_v58 }
 0x44d   :  { %v369_v60 = vsel %vm109_vm0, %v365_v59, 0.0  ;;  %v375_v61 = vmul.f32 %v365_v59, %v365_v59 }
 0x44e   :  { %370 = vadd.xlane.f32.xlu1 %v369_v60 }
 0x44f   :  { %v379_v62 = vsel %vm109_vm0, %v375_v61, 0.0 }
 0x450   :  { %380 = vadd.xlane.f32.xlu2 %v379_v62 }
 0x4b9   :  { %v368_v63 = vpop.xlane.xlu0 %367 }
 0x4ba   :  { %v372_v57 = vmul.f32 %v368_v63, %v1040_v15 }
 0x4bb   :  { %v378_v0 = vpop.xlane.xlu2 %377 }
 0x4bc   :  { %v384_v1 = vmul.f32 %v372_v57, %v372_v57  ;;  %v382_v2 = vmul.f32 %v378_v0, %v1040_v15  ;;  %v390_v27 = vsub.f32 %v364_v51, %v372_v57 }
 0x4be   :  { %v386_v3 = vsub.f32 %v382_v2, %v384_v1 }
 0x4c0   :  { %v388_v5 = vmax.f32 %v386_v3, 0.0 }
 0x4c1   :  { %v371_v58 = vpop.xlane.xlu1 %370 }
 0x4c2   :  { %v392_v7 = vadd.f32 1e-12, %v388_v5  ;;  %v373_v8 = vmul.f32 %v371_v58, %v1040_v15  ;;  %v487_v58 = vperm.slane %v1055_v44, 7 }
 0x4c3   :  { %v381_v9 = vpop.xlane.xlu2 %380 }
 0x4c4   :  { %800 = vrsqrt.f32 %v392_v7  ;;  %v385_v10 = vmul.f32 %v373_v8, %v373_v8  ;;  %v383_v11 = vmul.f32 %v381_v9, %v1040_v15  ;;  %vm400_vm11 = vweird.f32 %v392_v7 }
 0x4c5   :  { %v391_v32 = vsub.f32 %v365_v59, %v373_v8 }
 0x4c6   :  { %v387_v12 = vsub.f32 %v383_v11, %v385_v10 }
 0x4c8   :  { %v389_v13 = vmax.f32 %v387_v12, 0.0 }
 0x4ca   :  { %v801_v14 = vpop.eup %800  ;;  %v393_v17 = vadd.f32 1e-12, %v389_v13 }
 0x4cb   :  { %v395_v16 = vmul.f32 %v801_v14, %v392_v7  ;;  %vm401_vm10 = vweird.f32 %v801_v14 }
 0x4cc   :  { %802 = vrsqrt.f32 %v393_v17  ;;  %vm402_vm12 = vmor %vm400_vm11, %vm401_vm10  ;;  %vm410_vm14 = vweird.f32 %v393_v17 }
 0x4cd   :  { %v396_v18 = vmul.f32 %v801_v14, %v395_v16 }
 0x4cf   :  { %v397_v19 = vmul.f32 0.5, %v396_v18 }
 0x4d1   :  { %v398_v20 = vsub.f32 1.5, %v397_v19 }
 0x4d2   :  { %v803_v21 = vpop.eup %802 }
 0x4d3   :  { %v399_v22 = vmul.f32 %v801_v14, %v398_v20  ;;  %v405_v23 = vmul.f32 %v803_v21, %v393_v17  ;;  %vm411_vm13 = vweird.f32 %v803_v21 }
 0x4d4   :  { %vm412_vm15 = vmor %vm410_vm14, %vm411_vm13 }
 0x4d5   :  { %v406_v24 = vmul.f32 %v803_v21, %v405_v23  ;;  %v403_v25 = vsel %vm402_vm12, %v801_v14, %v399_v22 }
 0x4d6   :  { %v414_v29 = vmul.f32 %v403_v25, %v390_v27 }
 0x4d7   :  { %v407_v26 = vmul.f32 0.5, %v406_v24 }
 0x4d8   :  { %v417_v35 = vmul.f32 %v416_v30, %v414_v29  ;;  %v766_v29 = vld [vmem:[#allocation7 + $0x8] sm:$0xff] }
 0x4d9   :  { %v408_v28 = vsub.f32 1.5, %v407_v26  ;;  %624 = vmatpush.bf16.msra.mxu3 %v766_v29 }
 0x4da   :  { %v420_v38 = vadd.f32 %v419_v36, %v417_v35 }
 0x4db   :  { %v409_v31 = vmul.f32 %v803_v21, %v408_v28 }
 0x4dd   :  { %v413_v33 = vsel %vm412_vm15, %v803_v21, %v409_v31 }
 0x4de   :  { %v415_v34 = vmul.f32 %v413_v33, %v391_v32 }
 0x4e0   :  { %v418_v37 = vmul.f32 %v416_v30, %v415_v34  ;;  %v765_v34 = vld [vmem:[#allocation7] sm:$0xff] }
 0x4e1   :  { %625 = vmatpush.bf16.msra.mxu3 %v765_v34 }
 0x4e2   :  { %v421_v39 = vadd.f32 %v419_v36, %v418_v37 }
 0x4e4   :  { %v422_v40 = vpack.c.bf16 %v421_v39, %v420_v38 }
 0x4e6   :  { %719 = vmatmul.msk.bf16.vlgmr.msrb.gmra.mxu1 %vm109_vm0, %v422_v40 }
 0x563   :  { %v455_v47 = vpop.f32.mrf.mxu1 }
 0x564   :  { %v456_v48 = vadd.f32 %v783_v46, %v455_v47 }
 0x566   :  { %v462_v49 = vmul.f32 0.044715, %v456_v48  ;;  %v460_v1 = vmul.f32 0.5, %v456_v48 }
 0x568   :  { %v464_v50 = vmul.f32 %v462_v49, %v456_v48 }
 0x56a   :  { %v466_v51 = vmul.f32 %v464_v50, %v456_v48 }
 0x56b   :  { %v457_v52 = vpop.f32.mrf.mxu1 }
 0x56c   :  { %v468_v53 = vadd.f32 %v466_v51, %v456_v48  ;;  %v458_v54 = vadd.f32 %v783_v46, %v457_v52  ;;  %v582_v48 = vperm.slane %v1055_v44, 4  ;;  %v585_v51 = vperm.slane %v1055_v44, 5 }
 0x56e   :  { %v463_v55 = vmul.f32 0.044715, %v458_v54  ;;  %v470_v56 = vmul.f32 0.7978846, %v468_v53  ;;  %v461_v2 = vmul.f32 0.5, %v458_v54 }
 0x570   :  { %v465_v59 = vmul.f32 %v463_v55, %v458_v54  ;;  %804 = vtanh.f32 %v470_v56 }
 0x572   :  { %v467_v60 = vmul.f32 %v465_v59, %v458_v54 }
 0x574   :  { %v469_v61 = vadd.f32 %v467_v60, %v458_v54 }
 0x576   :  { %v471_v62 = vmul.f32 0.7978846, %v469_v61  ;;  %v805_v63 = vpop.eup %804 }
 0x577   :  { %v474_v57 = vadd.f32 1.0, %v805_v63 }
 0x578   :  { %806 = vtanh.f32 %v471_v62 }
 0x579   :  { %v476_v4 = vmul.f32 %v474_v57, %v460_v1 }
 0x57e   :  { %v807_v0 = vpop.eup %806 }
 0x57f   :  { %v475_v3 = vadd.f32 1.0, %v807_v0 }
 0x581   :  { %v477_v5 = vmul.f32 %v475_v3, %v461_v2 }
 0x583   :  { %v478_v6 = vpack.c.bf16 %v477_v5, %v476_v4  ;;  %v768_v5 = vld [vmem:[#allocation8 + $0x8] sm:$0xff] }
 0x584   :  { %662 = vmatpush.bf16.msra.mxu0 %v768_v5 }
 0x585   :  { %736 = vmatmul.msk.bf16.vlgmr.msrb.gmra.mxu2 %vm512_vm1, %v478_v6  ;;  %v767_v6 = vld [vmem:[#allocation8] sm:$0xff] }
 0x588   :  { %663 = vmatpush.bf16.msra.mxu0 %v767_v6 }
 0x608   :  { %v525_v7 = vpop.f32.mrf.mxu2 }
 0x609   :  { %v526_v8 = vadd.f32 %v525_v7, %v487_v58 }
 0x60b   :  { %v1121_v9 = vadd.f32 %v526_v8, %v420_v38 }
 0x60d   :  { %v532_v10 = vsel %vm109_vm0, %v1121_v9, 0.0  ;;  %v540_v18 = vmul.f32 %v1121_v9, %v1121_v9 }
 0x60e   :  { %533 = vadd.xlane.f32.xlu2 %v532_v10 }
 0x60f   :  { %v542_v19 = vsel %vm109_vm0, %v540_v18, 0.0 }
 0x610   :  { %v527_v11 = vpop.f32.mrf.mxu2 }
 0x611   :  { %v528_v12 = vadd.f32 %v527_v11, %v487_v58  ;;  %v784_v58 = vld [vmem:[%s1152_s4 + $0x8] ss:$0 sm:$0xff] }
 0x613   :  { %v531_v13 = vadd.f32 %v528_v12, %v421_v39  ;;  %v785_v12 = vld [vmem:[%s1158_s10] ss:$0 sm:$0xff] }
 0x615   :  { %v535_v14 = vsel %vm109_vm0, %v531_v13, 0.0  ;;  %v541_v16 = vmul.f32 %v531_v13, %v531_v13 }
 0x616   :  { %536 = vadd.xlane.f32.xlu2 %v535_v14 }
 0x617   :  { %v545_v17 = vsel %vm109_vm0, %v541_v16, 0.0 }
 0x618   :  { %546 = vadd.xlane.f32.xlu0 %v545_v17 }
 0x61e   :  { %543 = vadd.xlane.f32.xlu2 %v542_v19 }
 0x681   :  { %v534_v20 = vpop.xlane.xlu2 %533 }
 0x682   :  { %v538_v26 = vmul.f32 %v534_v20, %v1040_v15 }
 0x684   :  { %v550_v31 = vmul.f32 %v538_v26, %v538_v26  ;;  %v556_v56 = vsub.f32 %v1121_v9, %v538_v26 }
 0x689   :  { %v537_v21 = vpop.xlane.xlu2 %536 }
 0x68a   :  { %v539_v22 = vmul.f32 %v537_v21, %v1040_v15 }
 0x68b   :  { %v547_v23 = vpop.xlane.xlu0 %546 }
 0x68c   :  { %v551_v24 = vmul.f32 %v539_v22, %v539_v22  ;;  %v549_v25 = vmul.f32 %v547_v23, %v1040_v15 }
 0x68e   :  { %v553_v27 = vsub.f32 %v549_v25, %v551_v24 }
 0x690   :  { %v555_v28 = vmax.f32 %v553_v27, 0.0 }
 0x691   :  { %v544_v30 = vpop.xlane.xlu2 %543 }
 0x692   :  { %v559_v32 = vadd.f32 1e-12, %v555_v28  ;;  %v548_v33 = vmul.f32 %v544_v30, %v1040_v15  ;;  %v557_v15 = vsub.f32 %v531_v13, %v539_v22 }
 0x694   :  { %808 = vrsqrt.f32 %v559_v32  ;;  %v552_v35 = vsub.f32 %v548_v33, %v550_v31  ;;  %vm576_vm3 = vweird.f32 %v559_v32 }
 0x696   :  { %v554_v36 = vmax.f32 %v552_v35, 0.0 }
 0x698   :  { %v558_v37 = vadd.f32 1e-12, %v554_v36 }
 0x69a   :  { %v809_v38 = vpop.eup %808  ;;  %810 = vrsqrt.f32 %v558_v37  ;;  %vm566_vm6 = vweird.f32 %v558_v37 }
 0x69b   :  { %v571_v39 = vmul.f32 %v809_v38, %v559_v32  ;;  %vm577_vm2 = vweird.f32 %v809_v38 }
 0x69c   :  { %vm578_vm4 = vmor %vm576_vm3, %vm577_vm2 }
 0x69d   :  { %v572_v40 = vmul.f32 %v809_v38, %v571_v39 }
 0x69f   :  { %v573_v41 = vmul.f32 0.5, %v572_v40 }
 0x6a0   :  { %v811_v42 = vpop.eup %810 }
 0x6a1   :  { %v574_v43 = vsub.f32 1.5, %v573_v41  ;;  %v561_v45 = vmul.f32 %v811_v42, %v558_v37  ;;  %vm567_vm5 = vweird.f32 %v811_v42 }
 0x6a2   :  { %vm568_vm7 = vmor %vm566_vm6, %vm567_vm5 }
 0x6a3   :  { %v575_v46 = vmul.f32 %v809_v38, %v574_v43  ;;  %v562_v47 = vmul.f32 %v811_v42, %v561_v45 }
 0x6a5   :  { %v579_v49 = vsel %vm578_vm4, %v809_v38, %v575_v46  ;;  %v563_v50 = vmul.f32 0.5, %v562_v47 }
 0x6a6   :  { %v581_v52 = vmul.f32 %v579_v49, %v557_v15 }
 0x6a7   :  { %v564_v53 = vsub.f32 1.5, %v563_v50 }
 0x6a8   :  { %v584_v54 = vmul.f32 %v582_v48, %v581_v52 }
 0x6a9   :  { %v565_v55 = vmul.f32 %v811_v42, %v564_v53 }
 0x6aa   :  { %v587_v59 = vadd.f32 %v585_v51, %v584_v54 }
 0x6ab   :  { %v569_v60 = vsel %vm568_vm7, %v811_v42, %v565_v55 }
 0x6ac   :  { %v589_v61 = vpack.c.bf16 %v587_v59, %v587_v59  ;;  %v580_v62 = vmul.f32 %v569_v60, %v556_v56 }
 0x6ae   :  { %v583_v63 = vmul.f32 %v582_v48, %v580_v62  ;;  %v598_v0 = vunpack.c.l.b16 %v589_v61 }
 0x6b0   :  { %v586_v57 = vadd.f32 %v585_v51, %v583_v63  ;;  %v599_v44 = vrot.slane %v598_v0, 7 }
 0x6b2   :  { %v588_v1 = vpack.c.bf16 %v586_v57, %v586_v57 }
 0x6b4   :  { %v597_v2 = vunpack.c.l.b16 %v588_v1 }
 0x6b6   :  { %v601_v3 = vsel %vm600_vm8, %v599_v44, %v597_v2 }
 0x6b7   :  { %v602_v4 = vpack.c.b16 %v601_v3, %v601_v3 }
 0x6b9   :  { %745 = vmatmul.msk.bf16.vlgmr.msra.gmra.mxu3 %vm109_vm0, %v602_v4 }
 0x73c   :  { %v627_v7 = vpop.f32.mrf.mxu3 }
 0x73d   :  { %v628_v8 = vadd.f32 %v784_v58, %v627_v7 }
 0x73f   :  { %812 = vtanh.f32 %v628_v8 }
 0x744   :  { %v629_v9 = vpop.f32.mrf.mxu3 }
 0x745   :  { %v813_v10 = vpop.eup %812 }
 0x746   :  { %v632_v11 = vpack.c.bf16 %v813_v10, %v813_v10 }
 0x748   :  { %754 = vmatmul.msk.bf16.vlgmr.msra.gmra.mxu0 %vm109_vm0, %v632_v11 }
 0x7c5   :  { %v665_v13 = vpop.f32.mrf.mxu0 }
 0x7c6   :  { %v666_v14 = vadd.f32 %v785_v12, %v665_v13 }
 0x7c8   :  { %669 = vst [vmem:[#allocation10] sm:$0x3] %v666_v14 }
 0x7c9   :  { %680 = dma.vmem_to_hbm [thread:$0]  %s676_s8, 32, %s678_s19, [#allocation4]  }
 0x7cd   :  { %v667_v16 = vpop.f32.mrf.mxu0 }
 0x7ce   :  { %940 = dma.done.wait [#allocation4], 32  }
 0x7cf   :  { %941 = vsyncadd [#allocation4], 4294967264 }
 0x7d0   :  { %685 = vsyncpa [#allocation3], 1 }
 0x7d1   :  { %686 = vsyncpa [#allocation6], 1 }
 0x7d2   :  { %687 = vsyncpa [#allocation9], 1 }
 0x7d3   :  { %688 = vsyncpa [#allocation4], 1 }

</bundles_post_ra>
